<compile_context>
chip_gen: v7x
topology: tpu7x:2x2x1
jax: 0.10.0
libtpu: 0.0.40
codegen_flags: <defaults>
</compile_context>

<pallas_src>
import functools

import jax
import jax.numpy as jnp
from jax import lax
from jax.experimental import pallas as pl
from jax.experimental.pallas import tpu as pltpu


def _round_up(a, m):
    return (a + m - 1) // m * m


def _sublane_multiple(dtype):
    # f32 -> 8 sublanes / vreg, bf16 -> 16, int8/fp8 -> 32
    return max(8, 32 // jnp.dtype(dtype).itemsize)


# ---------------------------------------------------------------------------
# Kernel
# ---------------------------------------------------------------------------
def mlp_layer_kernel(x_ref, w_ref, shift_ref, o_ref, *,
                     residual, residual_slice, block_d_out):
    """Fused (Linear + folded bias/BN) -> ReLU (-> +residual) for one tile."""
    x = x_ref[...]                                       # native dtype into the MXU
    h = jnp.dot(x, w_ref[...], preferred_element_type=jnp.float32)
    h = jnp.maximum(h + shift_ref[...], 0.0)             # folded bias+BN, then ReLU
    y = h.astype(o_ref.dtype)
    if residual:                                         # static; only when d_in == d_out
        if residual_slice:                               # d_out is tiled: matching x columns
            off = pl.multiple_of(pl.program_id(1) * block_d_out, block_d_out)
            r = x_ref[:, pl.ds(off, block_d_out)]
        else:
            r = x
        y = y + r                                        # residual in native dtype
    o_ref[...] = y


# ---------------------------------------------------------------------------
# Parameter folding (run once, off the hot path)
# ---------------------------------------------------------------------------
def prepare_mlp_params(w, b, gamma, beta, running_mean, running_var, *,
                       residual, batch_norm=True, eps=1e-5, param_dtype=None):
    """Fold Linear bias + eval-mode BatchNorm into (w', shift').

    Returns (wp, shift_p, d_out):
      wp:      (d_in, d_out_p) weights with BN scale folded into the columns,
               columns zero-padded to a 128-lane multiple (non-residual case).
      shift_p: (1, d_out_p) f32 per-channel shift = scale*b + beta - scale*mean.
    """
    d_in, d_out = w.shape
    f32 = jnp.float32
    if batch_norm:
        scale = gamma.astype(f32) * lax.rsqrt(running_var.astype(f32) + eps)
        shift = b.astype(f32) * scale + beta.astype(f32) - running_mean.astype(f32) * scale
    else:
        scale = jnp.ones((d_out,), f32)
        shift = b.astype(f32)
    wf = w.astype(f32) * scale[None, :]

    # Residual needs output columns aligned with the (unpadded) x columns, so
    # only lane-pad d_out in the non-residual case.  Zero pad keeps padded
    # output columns exactly 0 (sliced off after the call).
    d_out_p = d_out if residual else _round_up(d_out, 128)
    pad = d_out_p - d_out
    wp = jnp.pad(wf, ((0, 0), (0, pad))).astype(param_dtype or w.dtype)
    shift_p = jnp.pad(shift, (0, pad)).reshape(1, d_out_p)
    return wp, shift_p, d_out


# ---------------------------------------------------------------------------
# Hot path
# ---------------------------------------------------------------------------
@functools.partial(jax.jit, static_argnames=("residual", "block_n", "block_d_out"))
def mlp_layer_apply(x, wp, shift_p, *, residual, block_n=256, block_d_out=None):
    """x: (N, d_in); wp/shift_p from prepare_mlp_params. Returns (N, d_out_p)."""
    n, d_in = x.shape
    d_out_p = wp.shape[1]
    x_size = jnp.dtype(x.dtype).itemsize
    w_size = jnp.dtype(wp.dtype).itemsize

    # Batch tile: dtype-aware sublane multiple, no artificial ">=2 steps" cap.
    sub = _sublane_multiple(x.dtype)
    bn = _round_up(min(block_n, _round_up(n, sub)), sub)

    # d_out tile: keep the (double-buffered) W tile within a VMEM-friendly budget.
    if block_d_out is not None:
        tn = block_d_out
    else:
        tn = d_out_p
        max_w_tile = 16 << 20  # per-buffer cap so W fits v7x's 64 MiB scoped VMEM
        if d_in * tn * w_size > max_w_tile and d_out_p % 128 == 0:
            tn = max(128, (max_w_tile // (d_in * w_size)) // 128 * 128)
            while d_out_p % tn != 0 and tn > 128:
                tn -= 128

    def tile_bytes(bn_):
        return (2 * (bn_ * d_in * x_size + d_in * tn * w_size + tn * 4
                     + bn_ * tn * x_size)
                + 2 * bn_ * tn * 4)          # headroom for f32 intermediates

    while tile_bytes(bn) > (48 << 20) and bn > sub:
        bn = max(sub, _round_up(bn // 2, sub))

    n_i = pl.cdiv(n, bn)
    n_j = pl.cdiv(d_out_p, tn)
    vmem_limit = int(min(64 << 20, max(16 << 20, tile_bytes(bn) + (2 << 20))))

    cost = pl.CostEstimate(
        flops=2 * n * d_in * d_out_p + 3 * n * d_out_p,
        transcendentals=0,
        bytes_accessed=(n * d_in * x_size + d_in * d_out_p * w_size
                        + d_out_p * 4 + n * d_out_p * x_size),
    )

    kernel = functools.partial(
        mlp_layer_kernel,
        residual=residual,
        residual_slice=(residual and n_j > 1),
        block_d_out=tn,
    )

    return pl.pallas_call(
        kernel,
        out_shape=jax.ShapeDtypeStruct((n, d_out_p), x.dtype),
        grid_spec=pltpu.PrefetchScalarGridSpec(
            num_scalar_prefetch=0,
            grid=(n_i, n_j),
            in_specs=[
                pl.BlockSpec((bn, d_in), lambda i, j: (i, 0)),   # x tile (unpadded)
                pl.BlockSpec((d_in, tn), lambda i, j: (0, j)),   # folded W column tile
                pl.BlockSpec((1, tn), lambda i, j: (0, j)),      # folded bias+BN shift
            ],
            out_specs=pl.BlockSpec((bn, tn), lambda i, j: (i, j)),
        ),
        compiler_params=pltpu.CompilerParams(
            dimension_semantics=("parallel", "parallel"),
            vmem_limit_bytes=vmem_limit,
        ),
        cost_estimate=cost,
    )(x, wp, shift_p)


def mlp_layer(x, w, b, gamma, beta, running_mean, running_var, *,
              residual=True, batch_norm=True, dropout=0.0, eps=1e-5,
              block_n=256, block_d_out=None):
    """Full MLPLayer.forward (eval mode): Linear -> BN -> ReLU -> Dropout(0) -> +x."""
    assert dropout == 0.0  # TODO(synk): training-mode dropout (p>0) not implemented
    d_in, d_out = w.shape
    residual = residual and (d_in == d_out)   # module disables residual if dims differ
    wp, shift_p, d_out = prepare_mlp_params(
        w, b, gamma, beta, running_mean, running_var,
        residual=residual, batch_norm=batch_norm, eps=eps)
    out = mlp_layer_apply(x, wp, shift_p, residual=residual,
                          block_n=block_n, block_d_out=block_d_out)
    return out if out.shape[1] == d_out else out[:, :d_out]


def mlp_layer_ref(x, w, b, gamma, beta, running_mean, running_var, residual, eps=1e-5):
    """Pure-JAX reference reproducing MLPLayer.forward (eval mode, dropout p=0)."""
    h = x @ w + b
    h = (h - running_mean) / jnp.sqrt(running_var + eps) * gamma + beta
    h = jnp.maximum(h, 0.0)
    if residual:
        h = x + h
    return h


if __name__ == "__main__":
    key = jax.random.PRNGKey(0)
    n, in_dim, out_dim = 300, 64, 64   # in_dim == out_dim -> residual path active

    key, kx, kw, kb, kg, kbt, km, kv = jax.random.split(key, 8)
    x = jax.random.normal(kx, (n, in_dim), jnp.float32)

    bound = 1.0 / (in_dim ** 0.5)
    w = jax.random.uniform(kw, (in_dim, out_dim), jnp.float32, -bound, bound)
    b = jax.random.uniform(kb, (out_dim,), jnp.float32, -bound, bound)
    gamma = jax.random.uniform(kg, (out_dim,), jnp.float32, 0.5, 1.5)
    beta = 0.1 * jax.random.normal(kbt, (out_dim,), jnp.float32)
    running_mean = 0.1 * jax.random.normal(km, (out_dim,), jnp.float32)
    running_var = jax.random.uniform(kv, (out_dim,), jnp.float32, 0.5, 1.5)

    # 1) Residual branch; n=300 exercises a partial trailing batch tile (256 + 44).
    out = jax.block_until_ready(
        mlp_layer(x, w, b, gamma, beta, running_mean, running_var, residual=True))
    ref = mlp_layer_ref(x, w, b, gamma, beta, running_mean, running_var, True)
    assert out.shape == (n, out_dim)
    assert jnp.allclose(out, ref, atol=1e-4, rtol=1e-4)

    # Hot-path reuse: fold params once, call the jitted apply directly.
    wp, shift_p, _ = prepare_mlp_params(w, b, gamma, beta, running_mean, running_var,
                                        residual=True)
    out_r = jax.block_until_ready(mlp_layer_apply(x, wp, shift_p, residual=True))
    assert jnp.allclose(out_r, ref, atol=1e-4, rtol=1e-4)

    # 2) Non-residual, d_out=32 -> lane-padded W columns, output sliced back.
    out_dim2 = 32
    key, kw2, kb2 = jax.random.split(key, 3)
    w2 = jax.random.uniform(kw2, (in_dim, out_dim2), jnp.float32, -bound, bound)
    b2 = jax.random.uniform(kb2, (out_dim2,), jnp.float32, -bound, bound)
    out2 = jax.block_until_ready(
        mlp_layer(x, w2, b2, gamma[:out_dim2], beta[:out_dim2],
                  running_mean[:out_dim2], running_var[:out_dim2], residual=False))
    ref2 = mlp_layer_ref(x, w2, b2, gamma[:out_dim2], beta[:out_dim2],
                         running_mean[:out_dim2], running_var[:out_dim2], False)
    assert out2.shape == (n, out_dim2)
    assert jnp.allclose(out2, ref2, atol=1e-4, rtol=1e-4)

    # 3) Residual with a tiled d_out axis (v7x-style W column tiling + x-column slice).
    dim3 = 256
    key, kx3, kw3, kb3, kg3, kbt3, km3, kv3 = jax.random.split(key, 8)
    x3 = jax.random.normal(kx3, (n, dim3), jnp.float32)
    bound3 = 1.0 / (dim3 ** 0.5)
    w3 = jax.random.uniform(kw3, (dim3, dim3), jnp.float32, -bound3, bound3)
    b3 = jax.random.uniform(kb3, (dim3,), jnp.float32, -bound3, bound3)
    g3 = jax.random.uniform(kg3, (dim3,), jnp.float32, 0.5, 1.5)
    bt3 = 0.1 * jax.random.normal(kbt3, (dim3,), jnp.float32)
    m3 = 0.1 * jax.random.normal(km3, (dim3,), jnp.float32)
    v3 = jax.random.uniform(kv3, (dim3,), jnp.float32, 0.5, 1.5)
    out3 = jax.block_until_ready(
        mlp_layer(x3, w3, b3, g3, bt3, m3, v3, residual=True, block_d_out=128))
    ref3 = mlp_layer_ref(x3, w3, b3, g3, bt3, m3, v3, True)
    assert out3.shape == (n, dim3)
    assert jnp.allclose(out3, ref3, atol=1e-4, rtol=1e-4)

    print("KERNEL_OK")
</pallas_src>

<mosaic_0001>
module attributes {stable_mosaic.version = 11 : i64} {
  func.func @mlp_layer_kernel(%arg0: i32, %arg1: i32, %arg2: memref<256x64xf32, #tpu.memory_space<vmem>>, %arg3: memref<64x64xf32, #tpu.memory_space<vmem>>, %arg4: memref<1x64xf32, #tpu.memory_space<vmem>>, %arg5: memref<256x64xf32, #tpu.memory_space<vmem>>) attributes {dimension_semantics = [#tpu.dimension_semantics<parallel>, #tpu.dimension_semantics<parallel>], iteration_bounds = array<i64: 2, 1>, scalar_prefetch = 0 : i64, scratch_operands = 0 : i64, tpu.core_type = #tpu.core_type<tc>, window_params = [{transform_indices = @transform_0, window_bounds = array<i64: 256, 64>}, {transform_indices = @transform_1, window_bounds = array<i64: 64, 64>}, {transform_indices = @transform_2, window_bounds = array<i64: 1, 64>}, {transform_indices = @transform_3, window_bounds = array<i64: 256, 64>}]} {
    %c0 = arith.constant 0 : index
    %c0_0 = arith.constant 0 : index
    %0 = vector.load %arg2[%c0, %c0_0] : memref<256x64xf32, #tpu.memory_space<vmem>>, vector<256x64xf32>
    %c0_1 = arith.constant 0 : index
    %c0_2 = arith.constant 0 : index
    %1 = vector.load %arg3[%c0_1, %c0_2] : memref<64x64xf32, #tpu.memory_space<vmem>>, vector<64x64xf32>
    %cst = arith.constant dense<0.000000e+00> : vector<256x64xf32>
    %2 = tpu.matmul %0, %1, %cst {dimension_numbers = #tpu.dot_dimension_numbers<[1], [0], [0], [1], [0, 0, 1, 1], [], []>} : vector<256x64xf32>, vector<64x64xf32>, vector<256x64xf32> -> vector<256x64xf32>
    %c0_3 = arith.constant 0 : index
    %c0_4 = arith.constant 0 : index
    %3 = vector.load %arg4[%c0_3, %c0_4] : memref<1x64xf32, #tpu.memory_space<vmem>>, vector<1x64xf32>
    %4 = vector.broadcast %3 : vector<1x64xf32> to vector<256x64xf32>
    %5 = arith.addf %2, %4 : vector<256x64xf32>
    %cst_5 = arith.constant 0.000000e+00 : f32
    %6 = vector.broadcast %cst_5 : f32 to vector<256x64xf32>
    %7 = arith.maximumf %5, %6 : vector<256x64xf32>
    %8 = arith.addf %7, %0 : vector<256x64xf32>
    %c0_6 = arith.constant 0 : index
    %c0_7 = arith.constant 0 : index
    %9 = vector.load %arg5[%c0_6, %c0_7] : memref<256x64xf32, #tpu.memory_space<vmem>>, vector<256x64xf32>
    tpu.vector_store %arg5[%c0_6, %c0_7], %8 {strides = array<i32>} : memref<256x64xf32, #tpu.memory_space<vmem>>, vector<256x64xf32>,
    return
  }
  func.func @transform_0(%arg0: i32, %arg1: i32) -> (i32, i32) {
    %c0_i32 = arith.constant 0 : i32
    %c0_i32_0 = arith.constant 0 : i32
    return %arg0, %c0_i32 : i32, i32
  }
  func.func @transform_1(%arg0: i32, %arg1: i32) -> (i32, i32) {
    %c0_i32 = arith.constant 0 : i32
    %c0_i32_0 = arith.constant 0 : i32
    return %c0_i32, %arg1 : i32, i32
  }
  func.func @transform_2(%arg0: i32, %arg1: i32) -> (i32, i32) {
    %c0_i32 = arith.constant 0 : i32
    %c0_i32_0 = arith.constant 0 : i32
    return %c0_i32, %arg1 : i32, i32
  }
  func.func @transform_3(%arg0: i32, %arg1: i32) -> (i32, i32) {
    %c0_i32 = arith.constant 0 : i32
    return %arg0, %arg1 : i32, i32
  }
}

</mosaic_0001>

<bundles_post_ra>
// kernel: mlp_layer_apply.1
= control target key start
LH: loop header
LB: loop body
LE: loop exit
PB: predicated region body
PF: predicated region fallthrough
CT: control target
= control target key end

     0   :  { %s1498_s12 = smov 0   ;;  %s1500_s13 = smov 0   ;;  %s2015_s0 = inlined_call_operand.vmem [shape: f32[300,64], index: 0, kind: input, shape index: {}]   ;;  %s2016_s1 = inlined_call_operand.vmem [shape: f32[64,64], index: 1, kind: input, shape index: {}]   ;;  %s2017_s2 = inlined_call_operand.vmem [shape: f32[1,64], index: 2, kind: input, shape index: {}]   ;;  %s2018_s3 = inlined_call_operand.vmem [shape: f32[300,64], index: 3, kind: output, shape index: {}]  }
   0x1   :  { %s1502_s14 = smov 0   ;;  %s1504_s15 = smov 0  }
   0x2   :  { %s1506_s16 = smov 0  }
   0x3 LB: > { %s1079_s17 = sadd.s32 4294967295, %s1444_s16   ;;  %s25_s18 = sadd.s32 1, %s1440_s15  ;;  %s1444_s16 = sphi %s1506_s16, %s13_s16   ;;  %s1440_s15 = sphi %s1504_s15, %s2028_s15   ;;  %s1436_s14 = sphi %s1502_s14, %s2027_s14   ;;  %s1432_s13 = sphi %s1500_s13, %s2026_s13   ;;  %s1428_s12 = sphi %s1498_s12, %s2025_s12  }
   0x4   : > { %p27_p0 = scmp.ge.s32.totalorder %s25_s18, 2  ;;  %s112_s19 = sadd.s32 1, %s1432_s13 }
   0x5   : > { %p122_p1 = scmp.ne.s32.totalorder %s1432_s13, %s1428_s12  ;;  %p123_p2 = scmp.eq.s32.totalorder %s1079_s17, 1 }
   0x6   : > { %s2030_s18 = smov (%p27_p0, %s25_s18), 0  ;;  %p1085_p4 = scmp.ge.s32.totalorder %s1444_s16, 1 }
   0x7   : > { %p1530_p3 = por %p123_p2, %p122_p1  ;;  %s107_s21 = ssub.s32 %s1440_s15, %s2030_s18 }
   0x8   : > { %p177_p5 = scmp.lt.s32.totalorder %s1444_s16, 3  ;;  %p110_p6 = scmp.eq.s32.totalorder %s107_s21, 0 }
   0xa   : > { %p178_p7 = pnand %p1085_p4, %p177_p5 }
   0xb   : > { %s1539_s22 = scalar_select %p110_p6, %s1432_s13, %s112_s19  }
   0xc   : > { %181 = sbr.rel (%p178_p7) target bundleno = 336 (0x150), region = 32  ;;  %v269_v0 = vld [vmem:[%s2016_s1] sm:$0xff] (!%p178_p7)  ;;  %v270_v1 = vld [vmem:[%s2016_s1 + $0x8] sm:$0xff] (!%p178_p7)  ;;  %v271_v2 = vld [vmem:[%s2016_s1 + $0x10] sm:$0xff] (!%p178_p7)  ;;  %s1551_s29 = sshll.u32 (!%p178_p7), %s1436_s14, 5  ;;  %vm284_vm0 = vcmask (!%p178_p7), 523264  }
   0xd   : > { %v1246_v3 = vpack.c.bf16 (!%p178_p7), %v270_v1, %v269_v0  ;;  %v272_v4 = vld [vmem:[%s2016_s1 + $0x18] sm:$0xff] (!%p178_p7)  ;;  %p216_p8 = scmp.lt.s32.totalorder (!%p178_p7), %s1551_s29, 37  ;;  %v273_v6 = vld [vmem:[%s2016_s1 + $0x20] sm:$0xff] (!%p178_p7)  ;;  %v274_v7 = vld [vmem:[%s2016_s1 + $0x28] sm:$0xff] (!%p178_p7)  ;;  %s208_s26 = sand.u32 (!%p178_p7), 1, %s1428_s12  }
   0xe   : > { %v1250_v5 = vpack.c.bf16 (!%p178_p7), %v272_v4, %v271_v2  ;;  %v1254_v8 = vpack.c.bf16 (!%p178_p7), %v274_v7, %v273_v6  ;;  %v275_v9 = vld [vmem:[%s2016_s1 + $0x30] sm:$0xff] (!%p178_p7)  ;;  %v276_v10 = vld [vmem:[%s2016_s1 + $0x38] sm:$0xff] (!%p178_p7)  ;;  %v1739_v44 = vld [vmem:[%s2017_s2] ss:$0 sm:$0xff] (!%p178_p7)  ;;  %s1086_s30 = sshll.u32 (!%p178_p7), %s208_s26, 8 }
   0xf   : > { %1247 = vmatprep.subr.bf16.mxu0 (!%p178_p7), %v1246_v3  ;;  %1262 = vmatprep.subr.bf16.mxu1 (!%p178_p7), %v1246_v3  ;;  %v1258_v13 = vpack.c.bf16 (!%p178_p7), %v276_v10, %v275_v9  ;;  %s1753_s12 = scalar_lea.vmem (!%p178_p7), [#allocation2], %s1086_s30  }
  0x10   : > { %1249 = vmatpush3.bf16.msra.mxu0 (!%p178_p7), %v1246_v3  ;;  %1266 = vmatpush3.bf16.msra.mxu1 (!%p178_p7), %v1246_v3 }
  0x11   : > { %1251 = vmatprep.subr.bf16.mxu0 (!%p178_p7), %v1250_v5  ;;  %1263 = vmatprep.subr.bf16.mxu1 (!%p178_p7), %v1250_v5 }
  0x13   : > { %s217_s9 = scalar_select %p216_p8, %s1551_s29, 37 }
  0x14   : > { %1253 = vmatpush3.bf16.msra.mxu0 %v1250_v5  ;;  %1267 = vmatpush3.bf16.msra.mxu1 %v1250_v5  ;;  %s710_s4 = ssub.s32 (%p1530_p3), 38, %s1551_s29  ;;  %s1139_s5 = sshll.u32 (%p1530_p3), %s1436_s14, 8 }
  0x15   : > { %s1088_s10 = sshll.u32 %s217_s9, 3  ;;  %1255 = vmatprep.subr.bf16.mxu0 %v1254_v8  ;;  %1264 = vmatprep.subr.bf16.mxu1 %v1254_v8  ;;  %p711_p9 = scmp.lt.s32.totalorder (%p1530_p3), %s710_s4, 32 }
  0x16   : > { %s1573_s25 = scalar_lea.vmem %s2015_s0, %s1088_s10  ;;  %s1878_s8 = scalar_lea.vmem (%p1530_p3), %s2018_s3, %s1139_s5  }
  0x17   : > { %v1576_v11 = vld [vmem:[%s1573_s25] sm:$0xff]  ;;  %v1586_v14 = vld [vmem:[%s1573_s25 + $0x8] sm:$0xff]  ;;  %v1592_v16 = vld [vmem:[%s1573_s25 + $0x10] sm:$0xff] }
  0x18   : > { %v1579_v12 = vld [vmem:[%s1573_s25 + $0x80] sm:$0xff]  ;;  %1198 = vmatprep.mubr.msk.f32.mxu0 %vm284_vm0, %v1576_v11  ;;  %1257 = vmatpush3.bf16.msra.mxu0 %v1254_v8  ;;  %v1589_v15 = vld [vmem:[%s1573_s25 + $0x88] sm:$0xff]  ;;  %v1595_v17 = vld [vmem:[%s1573_s25 + $0x90] sm:$0xff] }
  0x19   : > { %1222 = vmatprep.mubr.msk.f32.mxu1 %vm284_vm0, %v1579_v12  ;;  %1268 = vmatpush3.bf16.msra.mxu1 %v1254_v8  ;;  %v1606_v18 = vld [vmem:[%s1573_s25 + $0x18] sm:$0xff]  ;;  %v1612_v20 = vld [vmem:[%s1573_s25 + $0x20] sm:$0xff]  ;;  %v1626_v22 = vld [vmem:[%s1573_s25 + $0x28] sm:$0xff] }
  0x1a   : > { %1259 = vmatprep.subr.bf16.mxu0 %v1258_v13  ;;  %1265 = vmatprep.subr.bf16.mxu1 %v1258_v13  ;;  %v1609_v19 = vld [vmem:[%s1573_s25 + $0x98] sm:$0xff]  ;;  %v1615_v21 = vld [vmem:[%s1573_s25 + $0xa0] sm:$0xff]  ;;  %v1629_v23 = vld [vmem:[%s1573_s25 + $0xa8] sm:$0xff] }
  0x1b   : > { %v1632_v24 = vld [vmem:[%s1573_s25 + $0x30] sm:$0xff]  ;;  %v1646_v26 = vld [vmem:[%s1573_s25 + $0x38] sm:$0xff]  ;;  %v1652_v28 = vld [vmem:[%s1573_s25 + $0x40] sm:$0xff] }
  0x1c   : > { %1261 = vmatpush3.bf16.msra.mxu0 %v1258_v13  ;;  %v1635_v25 = vld [vmem:[%s1573_s25 + $0xb0] sm:$0xff]  ;;  %v1649_v27 = vld [vmem:[%s1573_s25 + $0xb8] sm:$0xff]  ;;  %v1655_v29 = vld [vmem:[%s1573_s25 + $0xc0] sm:$0xff] }
  0x1d   : > { %1269 = vmatpush3.bf16.msra.mxu1 %v1258_v13  ;;  %v1666_v30 = vld [vmem:[%s1573_s25 + $0x48] sm:$0xff]  ;;  %v1672_v32 = vld [vmem:[%s1573_s25 + $0x50] sm:$0xff]  ;;  %v1686_v34 = vld [vmem:[%s1573_s25 + $0x58] sm:$0xff] }
  0x1e   : > { %v1669_v31 = vld [vmem:[%s1573_s25 + $0xc8] sm:$0xff]  ;;  %v1675_v33 = vld [vmem:[%s1573_s25 + $0xd0] sm:$0xff]  ;;  %v1689_v35 = vld [vmem:[%s1573_s25 + $0xd8] sm:$0xff] }
  0x1f   : > { %1199 = vmatmul.mubr.msk.f32.vlgmr.msra.gmra.mrb[0].mxu0 %vm284_vm0, %v1586_v14  ;;  %v1692_v36 = vld [vmem:[%s1573_s25 + $0x60] sm:$0xff]  ;;  %v1706_v38 = vld [vmem:[%s1573_s25 + $0x68] sm:$0xff]  ;;  %v1712_v40 = vld [vmem:[%s1573_s25 + $0x70] sm:$0xff] }
  0x20   : > { %1223 = vmatmul.mubr.msk.f32.vlgmr.msra.gmra.mrb[0].mxu1 %vm284_vm0, %v1589_v15  ;;  %1201 = vmatprep.mubr.msk.f32.mxu0 %vm284_vm0, %v1592_v16  ;;  %v1695_v37 = vld [vmem:[%s1573_s25 + $0xe0] sm:$0xff]  ;;  %v1709_v39 = vld [vmem:[%s1573_s25 + $0xe8] sm:$0xff]  ;;  %v1715_v41 = vld [vmem:[%s1573_s25 + $0xf0] sm:$0xff] }
  0x21   : > { %1225 = vmatprep.mubr.msk.f32.mxu1 %vm284_vm0, %v1595_v17  ;;  %v1726_v42 = vld [vmem:[%s1573_s25 + $0x78] sm:$0xff] }
  0x22   : > { %v1729_v43 = vld [vmem:[%s1573_s25 + $0xf8] sm:$0xff] }
  0x23   : > { %1202 = vmatmul.mubr.msk.f32.gmra.mrb[2].mxu0 %vm284_vm0, %v1606_v18 }
  0x24   : > { %1226 = vmatmul.mubr.msk.f32.gmra.mrb[2].mxu1 %vm284_vm0, %v1609_v19  ;;  %1204 = vmatprep.mubr.msk.f32.mxu0 %vm284_vm0, %v1612_v20 }
  0x25   : > { %1228 = vmatprep.mubr.msk.f32.mxu1 %vm284_vm0, %v1615_v21 }
  0x27   : > { %1205 = vmatmul.mubr.msk.f32.gmra.mrb[4].mxu0 %vm284_vm0, %v1626_v22 }
  0x28   : > { %1229 = vmatmul.mubr.msk.f32.gmra.mrb[4].mxu1 %vm284_vm0, %v1629_v23  ;;  %1207 = vmatprep.mubr.msk.f32.mxu0 %vm284_vm0, %v1632_v24 }
  0x29   : > { %1231 = vmatprep.mubr.msk.f32.mxu1 %vm284_vm0, %v1635_v25 }
  0x2b   : > { %1208 = vmatmul.mubr.msk.f32.gmra.mrb[6].mxu0 %vm284_vm0, %v1646_v26 }
  0x2c   : > { %1232 = vmatmul.mubr.msk.f32.gmra.mrb[6].mxu1 %vm284_vm0, %v1649_v27  ;;  %1210 = vmatprep.mubr.msk.f32.mxu0 %vm284_vm0, %v1652_v28 }
  0x2d   : > { %1234 = vmatprep.mubr.msk.f32.mxu1 %vm284_vm0, %v1655_v29 }
  0x2f   : > { %1211 = vmatmul.mubr.msk.f32.gmra.mrb[8].mxu0 %vm284_vm0, %v1666_v30 }
  0x30   : > { %1235 = vmatmul.mubr.msk.f32.gmra.mrb[8].mxu1 %vm284_vm0, %v1669_v31  ;;  %1213 = vmatprep.mubr.msk.f32.mxu0 %vm284_vm0, %v1672_v32 }
  0x31   : > { %1237 = vmatprep.mubr.msk.f32.mxu1 %vm284_vm0, %v1675_v33 }
  0x33   : > { %1214 = vmatmul.mubr.msk.f32.gmra.mrb[10].mxu0 %vm284_vm0, %v1686_v34 }
  0x34   : > { %1238 = vmatmul.mubr.msk.f32.gmra.mrb[10].mxu1 %vm284_vm0, %v1689_v35  ;;  %1216 = vmatprep.mubr.msk.f32.mxu0 %vm284_vm0, %v1692_v36 }
  0x35   : > { %1240 = vmatprep.mubr.msk.f32.mxu1 %vm284_vm0, %v1695_v37 }
  0x37   : > { %1217 = vmatmul.mubr.msk.f32.gmra.mrb[12].mxu0 %vm284_vm0, %v1706_v38 }
  0x38   : > { %1241 = vmatmul.mubr.msk.f32.gmra.mrb[12].mxu1 %vm284_vm0, %v1709_v39  ;;  %1219 = vmatprep.mubr.msk.f32.mxu0 %vm284_vm0, %v1712_v40 }
  0x39   : > { %1243 = vmatprep.mubr.msk.f32.mxu1 %vm284_vm0, %v1715_v41 }
  0x3b   : > { %1220 = vmatmul.mubr.msk.f32.gmra.mrb[14].mxu0 %vm284_vm0, %v1726_v42 }
  0x3c   : > { %1244 = vmatmul.mubr.msk.f32.gmra.mrb[14].mxu1 %vm284_vm0, %v1729_v43 }
  0xf2   : > { %v1200_v45 = vpop.f32.mrb[0].mxu0 }
  0xf3   : > { %v1224_v46 = vpop.f32.mrb[0].mxu1  ;;  %v453_v47 = vadd.f32 %v1200_v45, %v1739_v44  ;;  %v447_v49 = vpop.f32.mrb[1].mxu0 }
  0xf4   : > { %v533_v48 = vadd.f32 %v1224_v46, %v1739_v44  ;;  %v527_v50 = vpop.f32.mrb[1].mxu1  ;;  %v448_v51 = vadd.f32 %v1739_v44, %v447_v49 }
  0xf5   : > { %v528_v52 = vadd.f32 %v1739_v44, %v527_v50  ;;  %v607_v53 = vmax.f32 %v453_v47, 0.0 }
  0xf6   : > { %v623_v54 = vmax.f32 %v533_v48, 0.0  ;;  %v606_v55 = vmax.f32 %v448_v51, 0.0  ;;  %v1203_v57 = vpop.f32.mrb[2].mxu0 }
  0xf7   : > { %v622_v56 = vmax.f32 %v528_v52, 0.0  ;;  %v1227_v58 = vpop.f32.mrb[2].mxu1  ;;  %v639_v59 = vadd.f32 %v607_v53, %v1586_v14  ;;  %v463_v61 = vadd.f32 %v1203_v57, %v1739_v44  ;;  %v457_v63 = vpop.f32.mrb[3].mxu0 }
  0xf8   : > { %v655_v60 = vadd.f32 %v623_v54, %v1589_v15  ;;  %v543_v62 = vadd.f32 %v1227_v58, %v1739_v44  ;;  %v537_v0 = vpop.f32.mrb[3].mxu1  ;;  %v638_v1 = vadd.f32 %v606_v55, %v1576_v11  ;;  %v458_v3 = vadd.f32 %v1739_v44, %v457_v63 }
  0xf9   : > { %v654_v2 = vadd.f32 %v622_v56, %v1579_v12  ;;  %v538_v4 = vadd.f32 %v1739_v44, %v537_v0  ;;  %671 = vst.msk [vmem:[%s1753_s12 + $0x8] sm:$0xff] %vm284_vm0, %v639_v59  ;;  %v609_v5 = vmax.f32 %v463_v61, 0.0 }
  0xfa   : > { %687 = vst.msk [vmem:[%s1753_s12 + $0x88] sm:$0xff] %vm284_vm0, %v655_v60  ;;  %v625_v6 = vmax.f32 %v543_v62, 0.0  ;;  %670 = vst.msk [vmem:[%s1753_s12] sm:$0xff] %vm284_vm0, %v638_v1  ;;  %v608_v7 = vmax.f32 %v458_v3, 0.0  ;;  %v1206_v9 = vpop.f32.mrb[4].mxu0 }
  0xfb   : > { %686 = vst.msk [vmem:[%s1753_s12 + $0x80] sm:$0xff] %vm284_vm0, %v654_v2  ;;  %v624_v8 = vmax.f32 %v538_v4, 0.0  ;;  %v1230_v10 = vpop.f32.mrb[4].mxu1  ;;  %v641_v11 = vadd.f32 %v609_v5, %v1606_v18  ;;  %v473_v13 = vadd.f32 %v1206_v9, %v1739_v44  ;;  %v467_v15 = vpop.f32.mrb[5].mxu0 }
  0xfc   : > { %v657_v12 = vadd.f32 %v625_v6, %v1609_v19  ;;  %v553_v14 = vadd.f32 %v1230_v10, %v1739_v44  ;;  %v547_v45 = vpop.f32.mrb[5].mxu1  ;;  %v640_v46 = vadd.f32 %v608_v7, %v1592_v16  ;;  %v468_v48 = vadd.f32 %v1739_v44, %v467_v15 }
  0xfd   : > { %v656_v47 = vadd.f32 %v624_v8, %v1595_v17  ;;  %v548_v49 = vadd.f32 %v1739_v44, %v547_v45  ;;  %673 = vst.msk [vmem:[%s1753_s12 + $0x18] sm:$0xff] %vm284_vm0, %v641_v11  ;;  %v611_v18 = vmax.f32 %v473_v13, 0.0 }
  0xfe   : > { %689 = vst.msk [vmem:[%s1753_s12 + $0x98] sm:$0xff] %vm284_vm0, %v657_v12  ;;  %v627_v19 = vmax.f32 %v553_v14, 0.0  ;;  %672 = vst.msk [vmem:[%s1753_s12 + $0x10] sm:$0xff] %vm284_vm0, %v640_v46  ;;  %v610_v50 = vmax.f32 %v468_v48, 0.0  ;;  %v1209_v51 = vpop.f32.mrb[6].mxu0 }
  0xff   : > { %688 = vst.msk [vmem:[%s1753_s12 + $0x90] sm:$0xff] %vm284_vm0, %v656_v47  ;;  %v626_v16 = vmax.f32 %v548_v49, 0.0  ;;  %v1233_v17 = vpop.f32.mrb[6].mxu1  ;;  %v643_v52 = vadd.f32 %v611_v18, %v1626_v22  ;;  %v483_v54 = vadd.f32 %v1209_v51, %v1739_v44  ;;  %v477_v56 = vpop.f32.mrb[7].mxu0 }
 0x100   : > { %v659_v53 = vadd.f32 %v627_v19, %v1629_v23  ;;  %v563_v55 = vadd.f32 %v1233_v17, %v1739_v44  ;;  %v557_v57 = vpop.f32.mrb[7].mxu1  ;;  %v642_v58 = vadd.f32 %v610_v50, %v1612_v20  ;;  %v478_v60 = vadd.f32 %v1739_v44, %v477_v56 }
 0x101   : > { %v658_v59 = vadd.f32 %v626_v16, %v1615_v21  ;;  %v558_v61 = vadd.f32 %v1739_v44, %v557_v57  ;;  %675 = vst.msk [vmem:[%s1753_s12 + $0x28] sm:$0xff] %vm284_vm0, %v643_v52  ;;  %v613_v22 = vmax.f32 %v483_v54, 0.0 }
 0x102   : > { %691 = vst.msk [vmem:[%s1753_s12 + $0xa8] sm:$0xff] %vm284_vm0, %v659_v53  ;;  %v629_v23 = vmax.f32 %v563_v55, 0.0  ;;  %674 = vst.msk [vmem:[%s1753_s12 + $0x20] sm:$0xff] %vm284_vm0, %v642_v58  ;;  %v612_v62 = vmax.f32 %v478_v60, 0.0  ;;  %v1212_v63 = vpop.f32.mrb[8].mxu0 }
 0x103   : > { %690 = vst.msk [vmem:[%s1753_s12 + $0xa0] sm:$0xff] %vm284_vm0, %v658_v59  ;;  %v628_v20 = vmax.f32 %v558_v61, 0.0  ;;  %v1236_v21 = vpop.f32.mrb[8].mxu1  ;;  %v645_v0 = vadd.f32 %v613_v22, %v1646_v26  ;;  %v493_v2 = vadd.f32 %v1212_v63, %v1739_v44  ;;  %v487_v4 = vpop.f32.mrb[9].mxu0 }
 0x104   : > { %v661_v1 = vadd.f32 %v629_v23, %v1649_v27  ;;  %v573_v3 = vadd.f32 %v1236_v21, %v1739_v44  ;;  %v567_v5 = vpop.f32.mrb[9].mxu1  ;;  %v644_v6 = vadd.f32 %v612_v62, %v1632_v24  ;;  %v488_v8 = vadd.f32 %v1739_v44, %v487_v4 }
 0x105   : > { %v660_v7 = vadd.f32 %v628_v20, %v1635_v25  ;;  %v568_v9 = vadd.f32 %v1739_v44, %v567_v5  ;;  %677 = vst.msk [vmem:[%s1753_s12 + $0x38] sm:$0xff] %vm284_vm0, %v645_v0  ;;  %v615_v26 = vmax.f32 %v493_v2, 0.0 }
 0x106   : > { %693 = vst.msk [vmem:[%s1753_s12 + $0xb8] sm:$0xff] %vm284_vm0, %v661_v1  ;;  %v631_v27 = vmax.f32 %v573_v3, 0.0  ;;  %676 = vst.msk [vmem:[%s1753_s12 + $0x30] sm:$0xff] %vm284_vm0, %v644_v6  ;;  %v614_v10 = vmax.f32 %v488_v8, 0.0  ;;  %v1215_v11 = vpop.f32.mrb[10].mxu0 }
 0x107   : > { %692 = vst.msk [vmem:[%s1753_s12 + $0xb0] sm:$0xff] %vm284_vm0, %v660_v7  ;;  %v630_v24 = vmax.f32 %v568_v9, 0.0  ;;  %v1239_v25 = vpop.f32.mrb[10].mxu1  ;;  %v647_v12 = vadd.f32 %v615_v26, %v1666_v30  ;;  %v503_v14 = vadd.f32 %v1215_v11, %v1739_v44  ;;  %v497_v45 = vpop.f32.mrb[11].mxu0 }
 0x108   : > { %v663_v13 = vadd.f32 %v631_v27, %v1669_v31  ;;  %v583_v15 = vadd.f32 %v1239_v25, %v1739_v44  ;;  %v577_v46 = vpop.f32.mrb[11].mxu1  ;;  %v646_v47 = vadd.f32 %v614_v10, %v1652_v28  ;;  %v498_v49 = vadd.f32 %v1739_v44, %v497_v45 }
 0x109   : > { %v662_v48 = vadd.f32 %v630_v24, %v1655_v29  ;;  %v578_v18 = vadd.f32 %v1739_v44, %v577_v46  ;;  %679 = vst.msk [vmem:[%s1753_s12 + $0x48] sm:$0xff] %vm284_vm0, %v647_v12  ;;  %v617_v30 = vmax.f32 %v503_v14, 0.0 }
 0x10a   : > { %695 = vst.msk [vmem:[%s1753_s12 + $0xc8] sm:$0xff] %vm284_vm0, %v663_v13  ;;  %v633_v31 = vmax.f32 %v583_v15, 0.0  ;;  %678 = vst.msk [vmem:[%s1753_s12 + $0x40] sm:$0xff] %vm284_vm0, %v646_v47  ;;  %v616_v19 = vmax.f32 %v498_v49, 0.0  ;;  %v1218_v50 = vpop.f32.mrb[12].mxu0 }
 0x10b   : > { %694 = vst.msk [vmem:[%s1753_s12 + $0xc0] sm:$0xff] %vm284_vm0, %v662_v48  ;;  %v632_v28 = vmax.f32 %v578_v18, 0.0  ;;  %v1242_v29 = vpop.f32.mrb[12].mxu1  ;;  %v649_v16 = vadd.f32 %v617_v30, %v1686_v34  ;;  %v513_v17 = vadd.f32 %v1218_v50, %v1739_v44  ;;  %v507_v53 = vpop.f32.mrb[13].mxu0 }
 0x10c   : > { %v665_v51 = vadd.f32 %v633_v31, %v1689_v35  ;;  %v593_v52 = vadd.f32 %v1242_v29, %v1739_v44  ;;  %v587_v54 = vpop.f32.mrb[13].mxu1  ;;  %v648_v55 = vadd.f32 %v616_v19, %v1672_v32  ;;  %v508_v57 = vadd.f32 %v1739_v44, %v507_v53 }
 0x10d   : > { %v664_v56 = vadd.f32 %v632_v28, %v1675_v33  ;;  %v588_v58 = vadd.f32 %v1739_v44, %v587_v54  ;;  %681 = vst.msk [vmem:[%s1753_s12 + $0x58] sm:$0xff] %vm284_vm0, %v649_v16  ;;  %v619_v34 = vmax.f32 %v513_v17, 0.0 }
 0x10e   : > { %697 = vst.msk [vmem:[%s1753_s12 + $0xd8] sm:$0xff] %vm284_vm0, %v665_v51  ;;  %v635_v35 = vmax.f32 %v593_v52, 0.0  ;;  %680 = vst.msk [vmem:[%s1753_s12 + $0x50] sm:$0xff] %vm284_vm0, %v648_v55  ;;  %v618_v59 = vmax.f32 %v508_v57, 0.0  ;;  %v1221_v60 = vpop.f32.mrb[14].mxu0 }
 0x10f   : > { %696 = vst.msk [vmem:[%s1753_s12 + $0xd0] sm:$0xff] %vm284_vm0, %v664_v56  ;;  %v634_v32 = vmax.f32 %v588_v58, 0.0  ;;  %v1245_v33 = vpop.f32.mrb[14].mxu1  ;;  %v651_v61 = vadd.f32 %v619_v34, %v1706_v38  ;;  %v523_v23 = vadd.f32 %v1221_v60, %v1739_v44  ;;  %v517_v20 = vpop.f32.mrb[15].mxu0 }
 0x110   : > { %v667_v22 = vadd.f32 %v635_v35, %v1709_v39  ;;  %v603_v62 = vadd.f32 %v1245_v33, %v1739_v44  ;;  %v597_v63 = vpop.f32.mrb[15].mxu1  ;;  %v650_v21 = vadd.f32 %v618_v59, %v1692_v36  ;;  %v518_v1 = vadd.f32 %v1739_v44, %v517_v20 }
 0x111   : > { %v666_v0 = vadd.f32 %v634_v32, %v1695_v37  ;;  %v598_v2 = vadd.f32 %v1739_v44, %v597_v63  ;;  %683 = vst.msk [vmem:[%s1753_s12 + $0x68] sm:$0xff] %vm284_vm0, %v651_v61  ;;  %v621_v38 = vmax.f32 %v523_v23, 0.0  ;;  %708 = sbr.rel (!%p1530_p3) target bundleno = 336 (0x150), region = 36 }
 0x112   : > { %699 = vst.msk [vmem:[%s1753_s12 + $0xe8] sm:$0xff] %vm284_vm0, %v667_v22  ;;  %v637_v39 = vmax.f32 %v603_v62, 0.0  ;;  %682 = vst.msk [vmem:[%s1753_s12 + $0x60] sm:$0xff] %vm284_vm0, %v650_v21  ;;  %v620_v36 = vmax.f32 %v518_v1, 0.0 }
 0x113   : > { %698 = vst.msk [vmem:[%s1753_s12 + $0xe0] sm:$0xff] %vm284_vm0, %v666_v0  ;;  %v636_v3 = vmax.f32 %v598_v2, 0.0  ;;  %v653_v37 = vadd.f32 %v621_v38, %v1726_v42 }
 0x114   : > { %v669_v4 = vadd.f32 %v637_v39, %v1729_v43  ;;  %v652_v5 = vadd.f32 %v620_v36, %v1712_v40 }
 0x115   : > { %v668_v44 = vadd.f32 %v636_v3, %v1715_v41  ;;  %685 = vst.msk [vmem:[%s1753_s12 + $0x78] sm:$0xff] %vm284_vm0, %v653_v37 }
 0x116   : > { %701 = vst.msk [vmem:[%s1753_s12 + $0xf8] sm:$0xff] %vm284_vm0, %v669_v4  ;;  %684 = vst.msk [vmem:[%s1753_s12 + $0x70] sm:$0xff] %vm284_vm0, %v652_v5 }
 0x117   : > { %700 = vst.msk [vmem:[%s1753_s12 + $0xf0] sm:$0xff] %vm284_vm0, %v668_v44 }
 0x118   : > { %s2032_s4 = smov (!%p711_p9, %s710_s4), 32 }
 0x119   : > { %s1124_s9 = sshll.u32 %s2032_s4, 7 }
 0x11a   : > { %p1127_p10 = scmp.eq.s32.totalorder %s1124_s9, 0 }
 0x11b   : > { %s1884_s10 = sshrl.u32 (!%p1127_p10), %s2032_s4, 5 }
 0x11c   : > { %720 = sbr.rel (%p1127_p10) target bundleno = 336 (0x150), region = 40  ;;  %p1128_p11 = scmp.le.s32.totalorder (!%p1127_p10), %s1884_s10, 0 }
 0x123   : > { %1009 = sbr.rel (%p1128_p11) target bundleno = 315 (0x13b), region = 122  ;;  %s2020_s14 = smov (!%p1128_p11), %s1878_s8 }
 0x124   : > { %s2021_s20 = smov (!%p1128_p11), %s1753_s12  ;;  %s1893_s29 = smov (!%p1128_p11), 0  }
 0x125   : > { %s1895_s11 = smov (!%p1128_p11), 0  }
 0x12a LB: >> { %v844_v40 = vld [vmem:[%s1452_s20] sm:$0xff]  ;;  %v846_v41 = vld [vmem:[%s1452_s20 + $0x8] sm:$0xff]  ;;  %v848_v42 = vld [vmem:[%s1452_s20 + $0x10] sm:$0xff]  ;;  %s908_s17 = sadd.s32 1, %s1456_s29  ;;  %s838_s11 = sadd.s32 1, %s1460_s11   ;;  %s1460_s11 = sphi %s1895_s11, %s838_s11   ;;  %s1456_s29 = sphi %s1893_s29, %s2024_s29   ;;  %s1452_s20 = sphi %s2021_s20, %s2023_s20   ;;  %s1448_s14 = sphi %s2020_s14, %s2022_s14  }
 0x12b   : >> { %845 = vst [vmem:[%s1448_s14] sm:$0xff] %v844_v40  ;;  %847 = vst [vmem:[%s1448_s14 + $0x8] sm:$0xff] %v846_v41  ;;  %v850_v43 = vld [vmem:[%s1452_s20 + $0x18] sm:$0xff]  ;;  %v852_v6 = vld [vmem:[%s1452_s20 + $0x20] sm:$0xff]  ;;  %p909_p12 = scmp.ge.s32.totalorder %s908_s17, %s1884_s10  ;;  %p837_p13 = scmp.ge.s32.totalorder %s838_s11, %s1884_s10 }
 0x12c   : >> { %849 = vst [vmem:[%s1448_s14 + $0x10] sm:$0xff] %v848_v42  ;;  %v854_v7 = vld [vmem:[%s1452_s20 + $0x28] sm:$0xff]  ;;  %851 = vst [vmem:[%s1448_s14 + $0x18] sm:$0xff] %v850_v43  ;;  %v856_v8 = vld [vmem:[%s1452_s20 + $0x30] sm:$0xff] }
 0x12d   : >> { %853 = vst [vmem:[%s1448_s14 + $0x20] sm:$0xff] %v852_v6  ;;  %855 = vst [vmem:[%s1448_s14 + $0x28] sm:$0xff] %v854_v7  ;;  %v858_v9 = vld [vmem:[%s1452_s20 + $0x38] sm:$0xff]  ;;  %v860_v26 = vld [vmem:[%s1452_s20 + $0x40] sm:$0xff]  ;;  %s2034_s17 = smov (%p909_p12, %s908_s17), 0 }
 0x12e   : >> { %857 = vst [vmem:[%s1448_s14 + $0x30] sm:$0xff] %v856_v8  ;;  %859 = vst [vmem:[%s1448_s14 + $0x38] sm:$0xff] %v858_v9  ;;  %v862_v27 = vld [vmem:[%s1452_s20 + $0x48] sm:$0xff]  ;;  %v864_v10 = vld [vmem:[%s1452_s20 + $0x50] sm:$0xff]  ;;  %s1129_s19 = sshll.u32 %s2034_s17, 8  ;;  %s2024_s29 = smov %s2034_s17 }
 0x12f   : >> { %861 = vst [vmem:[%s1448_s14 + $0x40] sm:$0xff] %v860_v26  ;;  %v866_v24 = vld [vmem:[%s1452_s20 + $0x58] sm:$0xff]  ;;  %863 = vst [vmem:[%s1448_s14 + $0x48] sm:$0xff] %v862_v27  ;;  %v868_v11 = vld [vmem:[%s1452_s20 + $0x60] sm:$0xff]  ;;  %s1951_s21 = scalar_lea.vmem %s1753_s12, %s1129_s19 [#allocation2]   ;;  %s914_s23 = scalar_lea.vmem %s1878_s8, %s1129_s19  }
 0x130   : >> { %865 = vst [vmem:[%s1448_s14 + $0x50] sm:$0xff] %v864_v10  ;;  %867 = vst [vmem:[%s1448_s14 + $0x58] sm:$0xff] %v866_v24  ;;  %v870_v25 = vld [vmem:[%s1452_s20 + $0x68] sm:$0xff]  ;;  %v872_v12 = vld [vmem:[%s1452_s20 + $0x70] sm:$0xff] }
 0x131   : >> { %869 = vst [vmem:[%s1448_s14 + $0x60] sm:$0xff] %v868_v11  ;;  %871 = vst [vmem:[%s1448_s14 + $0x68] sm:$0xff] %v870_v25  ;;  %v874_v13 = vld [vmem:[%s1452_s20 + $0x78] sm:$0xff]  ;;  %v876_v14 = vld [vmem:[%s1452_s20 + $0x80] sm:$0xff] }
 0x132   : >> { %873 = vst [vmem:[%s1448_s14 + $0x70] sm:$0xff] %v872_v12  ;;  %v878_v15 = vld [vmem:[%s1452_s20 + $0x88] sm:$0xff]  ;;  %875 = vst [vmem:[%s1448_s14 + $0x78] sm:$0xff] %v874_v13  ;;  %v880_v45 = vld [vmem:[%s1452_s20 + $0x90] sm:$0xff] }
 0x133   : >> { %877 = vst [vmem:[%s1448_s14 + $0x80] sm:$0xff] %v876_v14  ;;  %879 = vst [vmem:[%s1448_s14 + $0x88] sm:$0xff] %v878_v15  ;;  %v882_v46 = vld [vmem:[%s1452_s20 + $0x98] sm:$0xff]  ;;  %v884_v47 = vld [vmem:[%s1452_s20 + $0xa0] sm:$0xff] }
 0x134   : >> { %881 = vst [vmem:[%s1448_s14 + $0x90] sm:$0xff] %v880_v45  ;;  %883 = vst [vmem:[%s1448_s14 + $0x98] sm:$0xff] %v882_v46  ;;  %v886_v48 = vld [vmem:[%s1452_s20 + $0xa8] sm:$0xff]  ;;  %v888_v49 = vld [vmem:[%s1452_s20 + $0xb0] sm:$0xff]  ;;  %840 = sbr.rel (!%p837_p13) target bundleno = 298 (0x12a), region = 128 }
 0x135   : >> { %885 = vst [vmem:[%s1448_s14 + $0xa0] sm:$0xff] %v884_v47  ;;  %v890_v18 = vld [vmem:[%s1452_s20 + $0xb8] sm:$0xff]  ;;  %887 = vst [vmem:[%s1448_s14 + $0xa8] sm:$0xff] %v886_v48  ;;  %v892_v30 = vld [vmem:[%s1452_s20 + $0xc0] sm:$0xff] }
 0x136   : >> { %889 = vst [vmem:[%s1448_s14 + $0xb0] sm:$0xff] %v888_v49  ;;  %891 = vst [vmem:[%s1448_s14 + $0xb8] sm:$0xff] %v890_v18  ;;  %v894_v31 = vld [vmem:[%s1452_s20 + $0xc8] sm:$0xff]  ;;  %v896_v19 = vld [vmem:[%s1452_s20 + $0xd0] sm:$0xff] }
 0x137   : >> { %893 = vst [vmem:[%s1448_s14 + $0xc0] sm:$0xff] %v892_v30  ;;  %895 = vst [vmem:[%s1448_s14 + $0xc8] sm:$0xff] %v894_v31  ;;  %v898_v28 = vld [vmem:[%s1452_s20 + $0xd8] sm:$0xff]  ;;  %v900_v50 = vld [vmem:[%s1452_s20 + $0xe0] sm:$0xff] }
 0x138   : >> { %897 = vst [vmem:[%s1448_s14 + $0xd0] sm:$0xff] %v896_v19  ;;  %v902_v29 = vld [vmem:[%s1452_s20 + $0xe8] sm:$0xff]  ;;  %899 = vst [vmem:[%s1448_s14 + $0xd8] sm:$0xff] %v898_v28  ;;  %v904_v16 = vld [vmem:[%s1452_s20 + $0xf0] sm:$0xff] }
 0x139   : >> { %901 = vst [vmem:[%s1448_s14 + $0xe0] sm:$0xff] %v900_v50  ;;  %903 = vst [vmem:[%s1448_s14 + $0xe8] sm:$0xff] %v902_v29  ;;  %v906_v51 = vld [vmem:[%s1452_s20 + $0xf8] sm:$0xff]  ;;  %s2023_s20 = smov %s1951_s21 }
 0x13a   : >> { %905 = vst [vmem:[%s1448_s14 + $0xf0] sm:$0xff] %v904_v16  ;;  %907 = vst [vmem:[%s1448_s14 + $0xf8] sm:$0xff] %v906_v51  ;;  %s2022_s14 = smov %s914_s23 }
 0x13b PF: > { %s1992_s24 = sand.u32 31, %s2032_s4   ;;  %s1140_s25 = sshll.u32 %s1884_s10, 8 }
 0x13c   : > { %s919_s26 = scalar_lea.vmem %s1753_s12, %s1140_s25 [#allocation2]   ;;  %s921_s27 = scalar_lea.vmem %s1878_s8, %s1140_s25  }
 0x13d   : > { %p1134_p0 = scmp.le.s32.totalorder %s1992_s24, 0 }
 0x13e   : > { %s1462_s28 = smov (!%p1134_p0), %s921_s27   ;;  %s1466_s30 = smov (!%p1134_p0), %s919_s26  }
 0x13f   : > { %1023 = sbr.rel (%p1134_p0) target bundleno = 336 (0x150), region = 133  ;;  %s1470_s5 = smov (!%p1134_p0), 0  }
 0x140   : > { %s1474_s6 = smov (!%p1134_p0), 0  }
 0x146 LB: >> { %v931_v17 = vld [vmem:[%s1468_s30] sm:$0xff]  ;;  %s933_s4 = sadd.s32 1, %s1472_s5  ;;  %s925_s6 = sadd.s32 1, %s1476_s6   ;;  %s1476_s6 = sphi %s1474_s6, %s925_s6   ;;  %s1472_s5 = sphi %s1470_s5, %s1471_s5   ;;  %s1468_s30 = sphi %s1466_s30, %s938_s30   ;;  %s1464_s28 = sphi %s1462_s28, %s939_s28  }
 0x147   : >> { %932 = vst [vmem:[%s1464_s28] sm:$0xff] %v931_v17  ;;  %p934_p1 = scmp.ge.s32.totalorder %s933_s4, %s1992_s24  ;;  %p924_p2 = scmp.ge.s32.totalorder %s925_s6, %s1992_s24 }
 0x149   : >> { %s2036_s4 = smov (%p934_p1, %s933_s4), 0  ;;  %927 = sbr.rel (!%p924_p2) target bundleno = 326 (0x146), region = 139 }
 0x14a   : >> { %s1135_s12 = sshll.u32 %s2036_s4, 3  ;;  %s1471_s5 = smov %s2036_s4  }
 0x14b   : >> { %s938_s30 = scalar_lea.vmem %s919_s26, %s1135_s12 [#allocation2]   ;;  %s939_s28 = scalar_lea.vmem %s921_s27, %s1135_s12  }
 0x150 PF: > { %s13_s16 = sadd.s32 1, %s1444_s16   ;;  %s2025_s12 = smov %s1432_s13 }
 0x151   : > { %p10_p3 = scmp.ge.s32.totalorder %s13_s16, 4   ;;  %s2026_s13 = smov %s1539_s22 }
 0x152   : > { %s2027_s14 = smov %s1440_s15  ;;  %s2028_s15 = smov %s2030_s18 }
 0x153   :  { %12 = sbr.rel (!%p10_p3) target bundleno = 3 (0x3), region = 150 }

</bundles_post_ra>
